<compile_context>
chip_gen: v5e
topology: v5e:2x2
jax: 0.10.0
libtpu: 0.0.40
codegen_flags: <defaults>
</compile_context>

<pallas_src>
import jax
import jax.numpy as jnp
from jax.experimental import pallas as pl
from jax.experimental.pallas import tpu as pltpu

# ----------------------------- model config ---------------------------------
INPUT_DIM = 16
LATENT_DIM = 8
HIDDEN_DIMS = [32, 64]
NUM_CLASSES = 4

# Fused latent-head layout (rows of the (LAT_OUT, H1) matmul result):
#   [0 : L)            mu
#   [L : 2L)           logvar (pre-clip)
#   [2L : 2L+C)        classification logits (classifier folded into this head)
#   [2L+C : LAT_OUT)   zero rows (pad the classifier block to a sublane multiple)
_CLS_BLOCK = 8                               # NUM_CLASSES padded to 8 rows
LAT_OUT = 2 * LATENT_DIM + _CLS_BLOCK        # 24

# Fused output-slab layout (rows of the single (FEAT_TOTAL, TM) output):
_R_RECM = (0, INPUT_DIM)                                  # [0, 16)  x_rec_mean
_R_MU = (INPUT_DIM, INPUT_DIM + LATENT_DIM)               # [16, 24) mu
_R_LV = (_R_MU[1], _R_MU[1] + LATENT_DIM)                 # [24, 32) logvar
_R_RLV = (_R_LV[1], _R_LV[1] + INPUT_DIM)                 # [32, 48) x_rec_logvar
_R_CLS = (_R_RLV[1], _R_RLV[1] + _CLS_BLOCK)              # [48, 56) logits (+4 zero pad rows)
FEAT_TOTAL = _R_CLS[1]                                    # 56 (multiple of 8 sublanes)

_ROW_TILE_TARGET = 8192  # rows per grid step (lane axis tile; multiple of 128)


def _round_up(x, m):
    return (x + m - 1) // m * m


# ------------------------------- kernel -------------------------------------
def pae_kernel(
    # data inputs (rows on lanes)
    x_ref, eps_ref,
    # parameters (PyTorch layout: W is (out, in), b is (out, 1)), VMEM-resident
    w_e0_ref, b_e0_ref, w_e1_ref, b_e1_ref,          # encoder MLP
    w_lat_ref, b_lat_ref,                            # fused [mu ; logvar ; folded classifier ; pad]
    w_d0_ref, b_d0_ref, w_d1_ref, b_d1_ref,          # decoder_base (reversed hidden dims)
    w_rec_ref, b_rec_ref,                            # fused [fc_recon_mean ; fc_recon_logvar]
    # single fused output slab (FEAT_TOTAL, TM)
    out_ref,
):
    x = x_ref[...]                                   # (INPUT_DIM, TM)

    # ---- encoder: Linear + ReLU stack ----
    h = jnp.dot(w_e0_ref[...], x, preferred_element_type=jnp.float32) + b_e0_ref[...]
    h = jnp.maximum(h, 0.0)                          # (H0, TM)
    h = jnp.dot(w_e1_ref[...], h, preferred_element_type=jnp.float32) + b_e1_ref[...]
    h = jnp.maximum(h, 0.0)                          # (H1, TM)

    # ---- fused latent heads + folded classifier: one (LAT_OUT, H1) matmul ----
    lat = jnp.dot(w_lat_ref[...], h, preferred_element_type=jnp.float32) + b_lat_ref[...]
    mu = lat[:LATENT_DIM, :]                         # (L, TM)
    logvar = jnp.clip(lat[LATENT_DIM:2 * LATENT_DIM, :], -10.0, 5.0)
    cls_block = lat[2 * LATENT_DIM:, :]              # (8, TM): logits rows + exact-zero pad rows

    # ---- reparameterize: z = mu + eps * exp(0.5 * logvar) ----
    z = mu + eps_ref[...] * jnp.exp(0.5 * logvar)

    # ---- decoder base: Linear + ReLU stack (reversed hidden dims) ----
    d = jnp.dot(w_d0_ref[...], z, preferred_element_type=jnp.float32) + b_d0_ref[...]
    d = jnp.maximum(d, 0.0)                          # (H1, TM)
    d = jnp.dot(w_d1_ref[...], d, preferred_element_type=jnp.float32) + b_d1_ref[...]
    d = jnp.maximum(d, 0.0)                          # (H0, TM)

    # ---- fused reconstruction heads: one (2*IN, H0) matmul ----
    rec = jnp.dot(w_rec_ref[...], d, preferred_element_type=jnp.float32) + b_rec_ref[...]
    rec_mean = rec[:INPUT_DIM, :]
    rec_logvar = jnp.clip(rec[INPUT_DIM:, :], -3.0, 0.0)

    # ---- single fused, lane-dense output slab; every row range is 8-sublane aligned ----
    out_ref[_R_RECM[0]:_R_RECM[1], :] = rec_mean
    out_ref[_R_MU[0]:_R_MU[1], :] = mu
    out_ref[_R_LV[0]:_R_LV[1], :] = logvar
    out_ref[_R_RLV[0]:_R_RLV[1], :] = rec_logvar
    out_ref[_R_CLS[0]:_R_CLS[1], :] = cls_block


# ------------------------ one-time parameter fusion ---------------------------
def prepare_params(params):
    """Hoisted out of the per-call path: head fusion + exact classifier fold."""
    hp = jax.lax.Precision.HIGHEST
    h1 = HIDDEN_DIMS[-1]
    # logits = Wc @ mu + bc = (Wc Wmu) @ h + (Wc bmu + bc)  -- exact algebra.
    w_cls_eff = jnp.dot(params["w_cls"], params["w_mu"], precision=hp)        # (C, H1)
    b_cls_eff = jnp.dot(params["w_cls"], params["b_mu"], precision=hp) + params["b_cls"]
    pad = _CLS_BLOCK - NUM_CLASSES
    w_lat = jnp.concatenate(
        [params["w_mu"], params["w_lv"], w_cls_eff,
         jnp.zeros((pad, h1), jnp.float32)], axis=0)                          # (LAT_OUT, H1)
    b_lat = jnp.concatenate(
        [params["b_mu"], params["b_lv"], b_cls_eff,
         jnp.zeros((pad, 1), jnp.float32)], axis=0)                           # (LAT_OUT, 1)
    w_rec = jnp.concatenate([params["w_rm"], params["w_rlv"]], axis=0)        # (2*IN, H0)
    b_rec = jnp.concatenate([params["b_rm"], params["b_rlv"]], axis=0)        # (2*IN, 1)
    return (params["w_e0"], params["b_e0"], params["w_e1"], params["b_e1"],
            w_lat, b_lat,
            params["w_d0"], params["b_d0"], params["w_d1"], params["b_d1"],
            w_rec, b_rec)


# ------------------------------ wrapper --------------------------------------
@jax.jit
def probabilistic_ae_forward(x, eps, prepared_params):
    """x: (B, N, INPUT_DIM) or (M, INPUT_DIM). eps: (M, LATENT_DIM).
    prepared_params: tuple from prepare_params()."""
    original_shape = x.shape
    flat_x = x.reshape(-1, INPUT_DIM).astype(jnp.float32)
    flat_eps = eps.reshape(-1, LATENT_DIM).astype(jnp.float32)
    m = flat_x.shape[0]

    # Row tiling: rows on the lane axis -> tile must be a multiple of 128.
    m_pad128 = _round_up(m, 128)
    tm = min(_ROW_TILE_TARGET, m_pad128)
    if m_pad128 > 128 and tm == m_pad128:
        # Keep >= 2 grid steps whenever possible so v7x's second TensorCore has work
        # (no-op on v5e/v6e; per-step overhead is ~0.35 us, negligible).
        tm = _round_up(m_pad128 // 2, 128)
    m_pad = _round_up(m, tm)
    if m_pad != m:
        flat_x = jnp.pad(flat_x, ((0, m_pad - m), (0, 0)))
        flat_eps = jnp.pad(flat_eps, ((0, m_pad - m), (0, 0)))

    x_t = flat_x.T        # (INPUT_DIM, m_pad)  -- one input transpose in the wrapper
    eps_t = flat_eps.T    # (LATENT_DIM, m_pad)

    grid = (m_pad // tm,)

    def row_spec(feat):
        return pl.BlockSpec((feat, tm), lambda i: (0, i))

    def const_spec(arr):
        # Constant index_map: weights stay VMEM-resident across grid steps (no re-DMA).
        # TODO(synk): pipeline_mode=pl.Buffered(1) would also drop the redundant second
        # weight buffer (~tens of KB); left at the default to avoid relying on
        # pipeline_mode support for revisit-resident operands.
        return pl.BlockSpec(arr.shape, lambda i: (0, 0))

    in_specs = [row_spec(INPUT_DIM), row_spec(LATENT_DIM)]
    in_specs += [const_spec(p) for p in prepared_params]

    out_shape = jax.ShapeDtypeStruct((FEAT_TOTAL, m_pad), jnp.float32)
    out_spec = row_spec(FEAT_TOTAL)

    # Advisory cost estimate so XLA schedules around the custom call sensibly.
    h0, h1 = HIDDEN_DIMS
    flops_per_row = 2 * (
        INPUT_DIM * h0 + h0 * h1 + h1 * LAT_OUT
        + LATENT_DIM * h1 + h1 * h0 + h0 * 2 * INPUT_DIM
    )
    param_bytes = sum(int(p.size) * 4 for p in prepared_params)
    io_bytes_per_row = 4 * (INPUT_DIM + LATENT_DIM + FEAT_TOTAL)
    cost = pl.CostEstimate(
        flops=flops_per_row * m_pad,
        transcendentals=LATENT_DIM * m_pad,
        bytes_accessed=io_bytes_per_row * m_pad + param_bytes,
    )

    slab = pl.pallas_call(
        pae_kernel,
        out_shape=out_shape,
        grid=grid,
        in_specs=in_specs,
        out_specs=out_spec,
        compiler_params=pltpu.CompilerParams(
            dimension_semantics=("parallel",),        # v7x: shard row tiles across 2 TCs
            vmem_limit_bytes=32 * 1024 * 1024,        # covers v5e's 16 MiB default at tm=8192
        ),
        cost_estimate=cost,
    )(x_t, eps_t, *prepared_params)

    # Single transpose-back (one HBM pass for all five outputs), then cheap last-dim slices.
    full = slab[:, :m].T                              # (M, FEAT_TOTAL)
    x_rec_mean = full[:, _R_RECM[0]:_R_RECM[1]]
    mu = full[:, _R_MU[0]:_R_MU[1]]
    logvar = full[:, _R_LV[0]:_R_LV[1]]
    x_rec_logvar = full[:, _R_RLV[0]:_R_RLV[1]]
    logits = full[:, _R_CLS[0]:_R_CLS[0] + NUM_CLASSES]

    if len(original_shape) == 3:
        b, n = original_shape[0], original_shape[1]
        x_rec_mean = x_rec_mean.reshape(b, n, INPUT_DIM)
        x_rec_logvar = x_rec_logvar.reshape(b, n, INPUT_DIM)
        mu = mu.reshape(b, n, LATENT_DIM)
        logvar = logvar.reshape(b, n, LATENT_DIM)
        logits = logits.reshape(b, n, NUM_CLASSES)

    return x_rec_mean, mu, logvar, x_rec_logvar, logits


# -------------------------- deterministic init --------------------------------
def init_params(key):
    """Weights in PyTorch layout (out_dim, in_dim); biases as (out_dim, 1)."""
    def linear(k, din, dout):
        kw, kb = jax.random.split(k)
        scale = 1.0 / jnp.sqrt(jnp.float32(din))
        w = jax.random.uniform(kw, (dout, din), jnp.float32, -scale, scale)
        b = jax.random.uniform(kb, (dout, 1), jnp.float32, -scale, scale)
        return w, b

    keys = jax.random.split(key, 9)
    h0, h1 = HIDDEN_DIMS
    params = {}
    params["w_e0"], params["b_e0"] = linear(keys[0], INPUT_DIM, h0)
    params["w_e1"], params["b_e1"] = linear(keys[1], h0, h1)
    params["w_mu"], params["b_mu"] = linear(keys[2], h1, LATENT_DIM)
    params["w_lv"], params["b_lv"] = linear(keys[3], h1, LATENT_DIM)
    # decoder: reversed hidden dims [h1, h0]
    params["w_d0"], params["b_d0"] = linear(keys[4], LATENT_DIM, h1)
    params["w_d1"], params["b_d1"] = linear(keys[5], h1, h0)
    params["w_rm"], params["b_rm"] = linear(keys[6], h0, INPUT_DIM)
    params["w_rlv"], params["b_rlv"] = linear(keys[7], h0, INPUT_DIM)
    params["w_cls"], params["b_cls"] = linear(keys[8], LATENT_DIM, NUM_CLASSES)
    return params


# ----------------------- pure-JAX reference (for checking) --------------------
def reference_forward(x, eps, params):
    hp = jax.lax.Precision.HIGHEST
    flat_x = x.reshape(-1, INPUT_DIM).astype(jnp.float32)
    flat_eps = eps.reshape(-1, LATENT_DIM).astype(jnp.float32)

    def lin(v, w, b):
        return jnp.dot(v, w.T, precision=hp) + b[:, 0]

    h = jnp.maximum(lin(flat_x, params["w_e0"], params["b_e0"]), 0.0)
    h = jnp.maximum(lin(h, params["w_e1"], params["b_e1"]), 0.0)
    mu = lin(h, params["w_mu"], params["b_mu"])
    logvar = jnp.clip(lin(h, params["w_lv"], params["b_lv"]), -10.0, 5.0)
    z = mu + flat_eps * jnp.exp(0.5 * logvar)
    d = jnp.maximum(lin(z, params["w_d0"], params["b_d0"]), 0.0)
    d = jnp.maximum(lin(d, params["w_d1"], params["b_d1"]), 0.0)
    rec_mean = lin(d, params["w_rm"], params["b_rm"])
    rec_logvar = jnp.clip(lin(d, params["w_rlv"], params["b_rlv"]), -3.0, 0.0)
    logits = lin(mu, params["w_cls"], params["b_cls"])
    b_, n_ = x.shape[0], x.shape[1]
    return (rec_mean.reshape(b_, n_, INPUT_DIM),
            mu.reshape(b_, n_, LATENT_DIM),
            logvar.reshape(b_, n_, LATENT_DIM),
            rec_logvar.reshape(b_, n_, INPUT_DIM),
            logits.reshape(b_, n_, NUM_CLASSES))


# --------------------------------- main ---------------------------------------
if __name__ == "__main__":
    key = jax.random.PRNGKey(0)
    k_x, k_eps, k_p = jax.random.split(key, 3)

    batch, num_points = 2, 8
    x = jax.random.normal(k_x, (batch, num_points, INPUT_DIM), jnp.float32)
    # TODO(synk): reparameterization noise is drawn in plain JAX (glue); an in-kernel
    # pltpu.prng_seed/prng_random_bits path would remove the eps DMA but break bitwise
    # parity with jax.random, so it is left as an explicit input.
    eps = jax.random.normal(k_eps, (batch * num_points, LATENT_DIM), jnp.float32)
    params = init_params(k_p)
    prepared = prepare_params(params)   # one-time head fusion / classifier fold

    outs = probabilistic_ae_forward(x, eps, prepared)
    outs = jax.block_until_ready(outs)

    x_rec_mean, mu, logvar, x_rec_logvar, logits = outs
    assert x_rec_mean.shape == (batch, num_points, INPUT_DIM)
    assert mu.shape == (batch, num_points, LATENT_DIM)
    assert logvar.shape == (batch, num_points, LATENT_DIM)
    assert x_rec_logvar.shape == (batch, num_points, INPUT_DIM)
    assert logits.shape == (batch, num_points, NUM_CLASSES)
    assert bool(jnp.all(logvar >= -10.0)) and bool(jnp.all(logvar <= 5.0))
    assert bool(jnp.all(x_rec_logvar >= -3.0)) and bool(jnp.all(x_rec_logvar <= 0.0))

    # Numerical check against a pure-JAX reference of the same forward pass
    # (also validates the classifier fold and the fused output slab layout).
    ref = reference_forward(x, eps, params)
    for got, want in zip(outs, ref):
        assert got.shape == want.shape
        assert float(jnp.max(jnp.abs(got - want))) < 1e-3

    print("KERNEL_OK")
</pallas_src>

<mosaic_0001>
module attributes {stable_mosaic.version = 11 : i64} {
  func.func @pae_kernel(%arg0: i32, %arg1: memref<16x128xf32, #tpu.memory_space<vmem>>, %arg2: memref<8x128xf32, #tpu.memory_space<vmem>>, %arg3: memref<32x16xf32, #tpu.memory_space<vmem>>, %arg4: memref<32x1xf32, #tpu.memory_space<vmem>>, %arg5: memref<64x32xf32, #tpu.memory_space<vmem>>, %arg6: memref<64x1xf32, #tpu.memory_space<vmem>>, %arg7: memref<24x64xf32, #tpu.memory_space<vmem>>, %arg8: memref<24x1xf32, #tpu.memory_space<vmem>>, %arg9: memref<64x8xf32, #tpu.memory_space<vmem>>, %arg10: memref<64x1xf32, #tpu.memory_space<vmem>>, %arg11: memref<32x64xf32, #tpu.memory_space<vmem>>, %arg12: memref<32x1xf32, #tpu.memory_space<vmem>>, %arg13: memref<32x32xf32, #tpu.memory_space<vmem>>, %arg14: memref<32x1xf32, #tpu.memory_space<vmem>>, %arg15: memref<56x128xf32, #tpu.memory_space<vmem>>) attributes {dimension_semantics = [#tpu.dimension_semantics<parallel>], iteration_bounds = array<i64: 1>, scalar_prefetch = 0 : i64, scratch_operands = 0 : i64, tpu.core_type = #tpu.core_type<tc>, window_params = [{transform_indices = @transform_0, window_bounds = array<i64: 16, 128>}, {transform_indices = @transform_1, window_bounds = array<i64: 8, 128>}, {pipeline_mode = #tpu.pipeline_mode<synchronous>, transform_indices = @transform_2, window_bounds = array<i64: 32, 16>}, {pipeline_mode = #tpu.pipeline_mode<synchronous>, transform_indices = @transform_3, window_bounds = array<i64: 32, 1>}, {pipeline_mode = #tpu.pipeline_mode<synchronous>, transform_indices = @transform_4, window_bounds = array<i64: 64, 32>}, {pipeline_mode = #tpu.pipeline_mode<synchronous>, transform_indices = @transform_5, window_bounds = array<i64: 64, 1>}, {pipeline_mode = #tpu.pipeline_mode<synchronous>, transform_indices = @transform_6, window_bounds = array<i64: 24, 64>}, {pipeline_mode = #tpu.pipeline_mode<synchronous>, transform_indices = @transform_7, window_bounds = array<i64: 24, 1>}, {pipeline_mode = #tpu.pipeline_mode<synchronous>, transform_indices = @transform_8, window_bounds = array<i64: 64, 8>}, {pipeline_mode = #tpu.pipeline_mode<synchronous>, transform_indices = @transform_9, window_bounds = array<i64: 64, 1>}, {pipeline_mode = #tpu.pipeline_mode<synchronous>, transform_indices = @transform_10, window_bounds = array<i64: 32, 64>}, {pipeline_mode = #tpu.pipeline_mode<synchronous>, transform_indices = @transform_11, window_bounds = array<i64: 32, 1>}, {pipeline_mode = #tpu.pipeline_mode<synchronous>, transform_indices = @transform_12, window_bounds = array<i64: 32, 32>}, {pipeline_mode = #tpu.pipeline_mode<synchronous>, transform_indices = @transform_13, window_bounds = array<i64: 32, 1>}, {transform_indices = @transform_14, window_bounds = array<i64: 56, 128>}]} {
    %c0 = arith.constant 0 : index
    %c0_0 = arith.constant 0 : index
    %0 = vector.load %arg1[%c0, %c0_0] : memref<16x128xf32, #tpu.memory_space<vmem>>, vector<16x128xf32>
    %c0_1 = arith.constant 0 : index
    %c0_2 = arith.constant 0 : index
    %1 = vector.load %arg3[%c0_1, %c0_2] : memref<32x16xf32, #tpu.memory_space<vmem>>, vector<32x16xf32>
    %cst = arith.constant dense<0.000000e+00> : vector<32x128xf32>
    %2 = tpu.matmul %1, %0, %cst {dimension_numbers = #tpu.dot_dimension_numbers<[1], [0], [0], [1], [0, 0, 1, 1], [], []>} : vector<32x16xf32>, vector<16x128xf32>, vector<32x128xf32> -> vector<32x128xf32>
    %c0_3 = arith.constant 0 : index
    %c0_4 = arith.constant 0 : index
    %3 = vector.load %arg4[%c0_3, %c0_4] : memref<32x1xf32, #tpu.memory_space<vmem>>, vector<32x1xf32>
    %4 = vector.broadcast %3 : vector<32x1xf32> to vector<32x128xf32>
    %5 = arith.addf %2, %4 : vector<32x128xf32>
    %cst_5 = arith.constant 0.000000e+00 : f32
    %6 = vector.broadcast %cst_5 : f32 to vector<32x128xf32>
    %7 = arith.maximumf %5, %6 : vector<32x128xf32>
    %c0_6 = arith.constant 0 : index
    %c0_7 = arith.constant 0 : index
    %8 = vector.load %arg5[%c0_6, %c0_7] : memref<64x32xf32, #tpu.memory_space<vmem>>, vector<64x32xf32>
    %cst_8 = arith.constant dense<0.000000e+00> : vector<64x128xf32>
    %9 = tpu.matmul %8, %7, %cst_8 {dimension_numbers = #tpu.dot_dimension_numbers<[1], [0], [0], [1], [0, 0, 1, 1], [], []>} : vector<64x32xf32>, vector<32x128xf32>, vector<64x128xf32> -> vector<64x128xf32>
    %c0_9 = arith.constant 0 : index
    %c0_10 = arith.constant 0 : index
    %10 = vector.load %arg6[%c0_9, %c0_10] : memref<64x1xf32, #tpu.memory_space<vmem>>, vector<64x1xf32>
    %11 = vector.broadcast %10 : vector<64x1xf32> to vector<64x128xf32>
    %12 = arith.addf %9, %11 : vector<64x128xf32>
    %cst_11 = arith.constant 0.000000e+00 : f32
    %13 = vector.broadcast %cst_11 : f32 to vector<64x128xf32>
    %14 = arith.maximumf %12, %13 : vector<64x128xf32>
    %c0_12 = arith.constant 0 : index
    %c0_13 = arith.constant 0 : index
    %15 = vector.load %arg7[%c0_12, %c0_13] : memref<24x64xf32, #tpu.memory_space<vmem>>, vector<24x64xf32>
    %cst_14 = arith.constant dense<0.000000e+00> : vector<24x128xf32>
    %16 = tpu.matmul %15, %14, %cst_14 {dimension_numbers = #tpu.dot_dimension_numbers<[1], [0], [0], [1], [0, 0, 1, 1], [], []>} : vector<24x64xf32>, vector<64x128xf32>, vector<24x128xf32> -> vector<24x128xf32>
    %c0_15 = arith.constant 0 : index
    %c0_16 = arith.constant 0 : index
    %17 = vector.load %arg8[%c0_15, %c0_16] : memref<24x1xf32, #tpu.memory_space<vmem>>, vector<24x1xf32>
    %18 = vector.broadcast %17 : vector<24x1xf32> to vector<24x128xf32>
    %19 = arith.addf %16, %18 : vector<24x128xf32>
    %20 = vector.extract_strided_slice %19 {offsets = [0, 0], sizes = [8, 128], strides = [1, 1]} : vector<24x128xf32> to vector<8x128xf32>
    %21 = vector.extract_strided_slice %19 {offsets = [8, 0], sizes = [8, 128], strides = [1, 1]} : vector<24x128xf32> to vector<8x128xf32>
    %cst_17 = arith.constant -1.000000e+01 : f32
    %cst_18 = arith.constant 5.000000e+00 : f32
    %22 = vector.broadcast %cst_17 : f32 to vector<8x128xf32>
    %23 = arith.maximumf %22, %21 : vector<8x128xf32>
    %24 = vector.broadcast %cst_18 : f32 to vector<8x128xf32>
    %25 = arith.minimumf %24, %23 : vector<8x128xf32>
    %26 = vector.extract_strided_slice %19 {offsets = [16, 0], sizes = [8, 128], strides = [1, 1]} : vector<24x128xf32> to vector<8x128xf32>
    %c0_19 = arith.constant 0 : index
    %c0_20 = arith.constant 0 : index
    %27 = vector.load %arg2[%c0_19, %c0_20] : memref<8x128xf32, #tpu.memory_space<vmem>>, vector<8x128xf32>
    %cst_21 = arith.constant 5.000000e-01 : f32
    %28 = vector.broadcast %cst_21 : f32 to vector<8x128xf32>
    %29 = arith.mulf %28, %25 : vector<8x128xf32>
    %30 = math.exp %29 : vector<8x128xf32>
    %31 = arith.mulf %27, %30 : vector<8x128xf32>
    %32 = arith.addf %20, %31 : vector<8x128xf32>
    %c0_22 = arith.constant 0 : index
    %c0_23 = arith.constant 0 : index
    %33 = vector.load %arg9[%c0_22, %c0_23] : memref<64x8xf32, #tpu.memory_space<vmem>>, vector<64x8xf32>
    %cst_24 = arith.constant dense<0.000000e+00> : vector<64x128xf32>
    %34 = tpu.matmul %33, %32, %cst_24 {dimension_numbers = #tpu.dot_dimension_numbers<[1], [0], [0], [1], [0, 0, 1, 1], [], []>} : vector<64x8xf32>, vector<8x128xf32>, vector<64x128xf32> -> vector<64x128xf32>
    %c0_25 = arith.constant 0 : index
    %c0_26 = arith.constant 0 : index
    %35 = vector.load %arg10[%c0_25, %c0_26] : memref<64x1xf32, #tpu.memory_space<vmem>>, vector<64x1xf32>
    %36 = vector.broadcast %35 : vector<64x1xf32> to vector<64x128xf32>
    %37 = arith.addf %34, %36 : vector<64x128xf32>
    %cst_27 = arith.constant 0.000000e+00 : f32
    %38 = vector.broadcast %cst_27 : f32 to vector<64x128xf32>
    %39 = arith.maximumf %37, %38 : vector<64x128xf32>
    %c0_28 = arith.constant 0 : index
    %c0_29 = arith.constant 0 : index
    %40 = vector.load %arg11[%c0_28, %c0_29] : memref<32x64xf32, #tpu.memory_space<vmem>>, vector<32x64xf32>
    %cst_30 = arith.constant dense<0.000000e+00> : vector<32x128xf32>
    %41 = tpu.matmul %40, %39, %cst_30 {dimension_numbers = #tpu.dot_dimension_numbers<[1], [0], [0], [1], [0, 0, 1, 1], [], []>} : vector<32x64xf32>, vector<64x128xf32>, vector<32x128xf32> -> vector<32x128xf32>
    %c0_31 = arith.constant 0 : index
    %c0_32 = arith.constant 0 : index
    %42 = vector.load %arg12[%c0_31, %c0_32] : memref<32x1xf32, #tpu.memory_space<vmem>>, vector<32x1xf32>
    %43 = vector.broadcast %42 : vector<32x1xf32> to vector<32x128xf32>
    %44 = arith.addf %41, %43 : vector<32x128xf32>
    %cst_33 = arith.constant 0.000000e+00 : f32
    %45 = vector.broadcast %cst_33 : f32 to vector<32x128xf32>
    %46 = arith.maximumf %44, %45 : vector<32x128xf32>
    %c0_34 = arith.constant 0 : index
    %c0_35 = arith.constant 0 : index
    %47 = vector.load %arg13[%c0_34, %c0_35] : memref<32x32xf32, #tpu.memory_space<vmem>>, vector<32x32xf32>
    %cst_36 = arith.constant dense<0.000000e+00> : vector<32x128xf32>
    %48 = tpu.matmul %47, %46, %cst_36 {dimension_numbers = #tpu.dot_dimension_numbers<[1], [0], [0], [1], [0, 0, 1, 1], [], []>} : vector<32x32xf32>, vector<32x128xf32>, vector<32x128xf32> -> vector<32x128xf32>
    %c0_37 = arith.constant 0 : index
    %c0_38 = arith.constant 0 : index
    %49 = vector.load %arg14[%c0_37, %c0_38] : memref<32x1xf32, #tpu.memory_space<vmem>>, vector<32x1xf32>
    %50 = vector.broadcast %49 : vector<32x1xf32> to vector<32x128xf32>
    %51 = arith.addf %48, %50 : vector<32x128xf32>
    %52 = vector.extract_strided_slice %51 {offsets = [0, 0], sizes = [16, 128], strides = [1, 1]} : vector<32x128xf32> to vector<16x128xf32>
    %53 = vector.extract_strided_slice %51 {offsets = [16, 0], sizes = [16, 128], strides = [1, 1]} : vector<32x128xf32> to vector<16x128xf32>
    %cst_39 = arith.constant -3.000000e+00 : f32
    %cst_40 = arith.constant 0.000000e+00 : f32
    %54 = vector.broadcast %cst_39 : f32 to vector<16x128xf32>
    %55 = arith.maximumf %54, %53 : vector<16x128xf32>
    %56 = vector.broadcast %cst_40 : f32 to vector<16x128xf32>
    %57 = arith.minimumf %56, %55 : vector<16x128xf32>
    %c0_41 = arith.constant 0 : index
    %c0_42 = arith.constant 0 : index
    %58 = vector.load %arg15[%c0_41, %c0_42] : memref<56x128xf32, #tpu.memory_space<vmem>>, vector<16x128xf32>
    tpu.vector_store %arg15[%c0_41, %c0_42], %52 {strides = array<i32>} : memref<56x128xf32, #tpu.memory_space<vmem>>, vector<16x128xf32>,
    %c16 = arith.constant 16 : index
    %c0_43 = arith.constant 0 : index
    %59 = vector.load %arg15[%c16, %c0_43] : memref<56x128xf32, #tpu.memory_space<vmem>>, vector<8x128xf32>
    tpu.vector_store %arg15[%c16, %c0_43], %20 {strides = array<i32>} : memref<56x128xf32, #tpu.memory_space<vmem>>, vector<8x128xf32>,
    %c24 = arith.constant 24 : index
    %c0_44 = arith.constant 0 : index
    %60 = vector.load %arg15[%c24, %c0_44] : memref<56x128xf32, #tpu.memory_space<vmem>>, vector<8x128xf32>
    tpu.vector_store %arg15[%c24, %c0_44], %25 {strides = array<i32>} : memref<56x128xf32, #tpu.memory_space<vmem>>, vector<8x128xf32>,
    %c32 = arith.constant 32 : index
    %c0_45 = arith.constant 0 : index
    %61 = vector.load %arg15[%c32, %c0_45] : memref<56x128xf32, #tpu.memory_space<vmem>>, vector<16x128xf32>
    tpu.vector_store %arg15[%c32, %c0_45], %57 {strides = array<i32>} : memref<56x128xf32, #tpu.memory_space<vmem>>, vector<16x128xf32>,
    %c48 = arith.constant 48 : index
    %c0_46 = arith.constant 0 : index
    %62 = vector.load %arg15[%c48, %c0_46] : memref<56x128xf32, #tpu.memory_space<vmem>>, vector<8x128xf32>
    tpu.vector_store %arg15[%c48, %c0_46], %26 {strides = array<i32>} : memref<56x128xf32, #tpu.memory_space<vmem>>, vector<8x128xf32>,
    return
  }
  func.func @transform_0(%arg0: i32) -> (i32, i32) {
    %c0_i32 = arith.constant 0 : i32
    %c0_i32_0 = arith.constant 0 : i32
    return %c0_i32, %arg0 : i32, i32
  }
  func.func @transform_1(%arg0: i32) -> (i32, i32) {
    %c0_i32 = arith.constant 0 : i32
    %c0_i32_0 = arith.constant 0 : i32
    return %c0_i32, %arg0 : i32, i32
  }
  func.func @transform_2(%arg0: i32) -> (i32, i32) {
    %c0_i32 = arith.constant 0 : i32
    %c0_i32_0 = arith.constant 0 : i32
    %c0_i32_1 = arith.constant 0 : i32
    return %c0_i32, %c0_i32_0 : i32, i32
  }
  func.func @transform_3(%arg0: i32) -> (i32, i32) {
    %c0_i32 = arith.constant 0 : i32
    %c0_i32_0 = arith.constant 0 : i32
    %c0_i32_1 = arith.constant 0 : i32
    return %c0_i32, %c0_i32_0 : i32, i32
  }
  func.func @transform_4(%arg0: i32) -> (i32, i32) {
    %c0_i32 = arith.constant 0 : i32
    %c0_i32_0 = arith.constant 0 : i32
    %c0_i32_1 = arith.constant 0 : i32
    return %c0_i32, %c0_i32_0 : i32, i32
  }
  func.func @transform_5(%arg0: i32) -> (i32, i32) {
    %c0_i32 = arith.constant 0 : i32
    %c0_i32_0 = arith.constant 0 : i32
    %c0_i32_1 = arith.constant 0 : i32
    return %c0_i32, %c0_i32_0 : i32, i32
  }
  func.func @transform_6(%arg0: i32) -> (i32, i32) {
    %c0_i32 = arith.constant 0 : i32
    %c0_i32_0 = arith.constant 0 : i32
    %c0_i32_1 = arith.constant 0 : i32
    return %c0_i32, %c0_i32_0 : i32, i32
  }
  func.func @transform_7(%arg0: i32) -> (i32, i32) {
    %c0_i32 = arith.constant 0 : i32
    %c0_i32_0 = arith.constant 0 : i32
    %c0_i32_1 = arith.constant 0 : i32
    return %c0_i32, %c0_i32_0 : i32, i32
  }
  func.func @transform_8(%arg0: i32) -> (i32, i32) {
    %c0_i32 = arith.constant 0 : i32
    %c0_i32_0 = arith.constant 0 : i32
    %c0_i32_1 = arith.constant 0 : i32
    return %c0_i32, %c0_i32_0 : i32, i32
  }
  func.func @transform_9(%arg0: i32) -> (i32, i32) {
    %c0_i32 = arith.constant 0 : i32
    %c0_i32_0 = arith.constant 0 : i32
    %c0_i32_1 = arith.constant 0 : i32
    return %c0_i32, %c0_i32_0 : i32, i32
  }
  func.func @transform_10(%arg0: i32) -> (i32, i32) {
    %c0_i32 = arith.constant 0 : i32
    %c0_i32_0 = arith.constant 0 : i32
    %c0_i32_1 = arith.constant 0 : i32
    return %c0_i32, %c0_i32_0 : i32, i32
  }
  func.func @transform_11(%arg0: i32) -> (i32, i32) {
    %c0_i32 = arith.constant 0 : i32
    %c0_i32_0 = arith.constant 0 : i32
    %c0_i32_1 = arith.constant 0 : i32
    return %c0_i32, %c0_i32_0 : i32, i32
  }
  func.func @transform_12(%arg0: i32) -> (i32, i32) {
    %c0_i32 = arith.constant 0 : i32
    %c0_i32_0 = arith.constant 0 : i32
    %c0_i32_1 = arith.constant 0 : i32
    return %c0_i32, %c0_i32_0 : i32, i32
  }
  func.func @transform_13(%arg0: i32) -> (i32, i32) {
    %c0_i32 = arith.constant 0 : i32
    %c0_i32_0 = arith.constant 0 : i32
    %c0_i32_1 = arith.constant 0 : i32
    return %c0_i32, %c0_i32_0 : i32, i32
  }
  func.func @transform_14(%arg0: i32) -> (i32, i32) {
    %c0_i32 = arith.constant 0 : i32
    %c0_i32_0 = arith.constant 0 : i32
    return %c0_i32, %arg0 : i32, i32
  }
}

</mosaic_0001>

<bundles_post_ra>
// kernel: probabilistic_ae_forward.1
= control target key start
LH: loop header
LB: loop body
LE: loop exit
PB: predicated region body
PF: predicated region fallthrough
CT: control target
= control target key end

     0   :  { %v642_v0 = vmov 0   ;;  %vm77_vm0 = vcmask 130048   ;;  %vm179_vm1 = vcmask 261120   ;;  %vm274_vm2 = vcmask 523264   ;;  %s974_s3 = inlined_call_operand.vmem [shape: f32[32,1], index: 3, kind: input, shape index: {}]   ;;  %s975_s0 = inlined_call_operand.vmem [shape: f32[16,128], index: 0, kind: input, shape index: {}]   ;;  %s976_s2 = inlined_call_operand.vmem [shape: f32[32,16], index: 2, kind: input, shape index: {}]   ;;  %s977_s5 = inlined_call_operand.vmem [shape: f32[64,1], index: 5, kind: input, shape index: {}]   ;;  %s978_s7 = inlined_call_operand.vmem [shape: f32[24,1], index: 7, kind: input, shape index: {}]   ;;  %s979_s9 = inlined_call_operand.vmem [shape: f32[64,1], index: 9, kind: input, shape index: {}]   ;;  %s980_s11 = inlined_call_operand.vmem [shape: f32[32,1], index: 11, kind: input, shape index: {}]   ;;  %s981_s13 = inlined_call_operand.vmem [shape: f32[32,1], index: 13, kind: input, shape index: {}]   ;;  %s982_s4 = inlined_call_operand.vmem [shape: f32[64,32], index: 4, kind: input, shape index: {}]   ;;  %s983_s6 = inlined_call_operand.vmem [shape: f32[24,64], index: 6, kind: input, shape index: {}]   ;;  %s984_s14 = inlined_call_operand.vmem [shape: f32[56,128], index: 14, kind: output, shape index: {}]   ;;  %s985_s1 = inlined_call_operand.vmem [shape: f32[8,128], index: 1, kind: input, shape index: {}]   ;;  %s986_s8 = inlined_call_operand.vmem [shape: f32[64,8], index: 8, kind: input, shape index: {}]   ;;  %s987_s10 = inlined_call_operand.vmem [shape: f32[32,64], index: 10, kind: input, shape index: {}]   ;;  %s988_s12 = inlined_call_operand.vmem [shape: f32[32,32], index: 12, kind: input, shape index: {}]  }
   0x1   :  { %638 = vset.pattern.permute.xlu1 %v642_v0  ;;  %637 = vset.pattern.permute.xlu0 %v642_v0  ;;  %v56_v1 = vld [vmem:[%s974_s3 + $0x18] sm:$0xff]  ;;  %v54_v2 = vld [vmem:[%s974_s3 + $0x8] sm:$0xff]  ;;  %v47_v4 = vld [vmem:[%s975_s0] sm:$0xff]  ;;  %vm374_vm3 = vcmask 64512  }
   0x2   :  { %v48_v3 = vld [vmem:[%s975_s0 + $0x8] sm:$0xff]  ;;  %74 = vperm.xlu0 %637, %v56_v1   ;;  %64 = vperm.xlu1 %638, %v54_v2   ;;  %v49_v5 = vld [vmem:[%s976_s2] sm:$0xff]  ;;  %v55_v6 = vld [vmem:[%s974_s3 + $0x10] sm:$0xff] }
   0x3   :  { %104 = vmatpush.msra.mxu0 %v48_v3  ;;  %639 = vset.pattern.permute.xlu2 %v642_v0  ;;  %v53_v7 = vld [vmem:[%s974_s3] sm:$0xff]  ;;  %v50_v8 = vld [vmem:[%s976_s2 + $0x8] sm:$0xff]  ;;  %v51_v11 = vld [vmem:[%s976_s2 + $0x10] sm:$0xff] }
   0x4   :  { %v136_v9 = vld [vmem:[%s977_s5 + $0x28] sm:$0xff]  ;;  %v135_v10 = vld [vmem:[%s977_s5 + $0x20] sm:$0xff]  ;;  %v133_v12 = vld [vmem:[%s977_s5 + $0x10] sm:$0xff] }
   0x5   :  { %105 = vmatpush.msra.mxu0 %v47_v4  ;;  %v132_v13 = vld [vmem:[%s977_s5 + $0x8] sm:$0xff]  ;;  %v52_v14 = vld [vmem:[%s976_s2 + $0x18] sm:$0xff]  ;;  %v256_v16 = vld [vmem:[%s978_s7] sm:$0xff] }
   0x6   :  { %605 = vmatmul.msk.f32.vlgmr.msra.gmra.mxu0 %vm77_vm0, %v49_v5  ;;  %v257_v15 = vld [vmem:[%s978_s7 + $0x8] sm:$0xff]  ;;  %v332_v17 = vld [vmem:[%s979_s9 + $0x30] sm:$0xff]  ;;  %v329_v19 = vld [vmem:[%s979_s9 + $0x18] sm:$0xff] }
   0x7   :  { %v331_v18 = vld [vmem:[%s979_s9 + $0x28] sm:$0xff]  ;;  %v328_v20 = vld [vmem:[%s979_s9 + $0x10] sm:$0xff]  ;;  %v326_v21 = vld [vmem:[%s979_s9] sm:$0xff] }
   0x8   :  { %v455_v22 = vld [vmem:[%s980_s11 + $0x18] sm:$0xff]  ;;  %v453_v23 = vld [vmem:[%s980_s11 + $0x8] sm:$0xff]  ;;  %v452_v24 = vld [vmem:[%s980_s11] sm:$0xff] }
   0x9   :  { %v528_v25 = vld [vmem:[%s981_s13 + $0x18] sm:$0xff]  ;;  %v258_v26 = vld [vmem:[%s978_s7 + $0x10] sm:$0xff]  ;;  %v526_v27 = vld [vmem:[%s981_s13 + $0x8] sm:$0xff] }
   0xa   :  { %69 = vperm.xlu0 %637, %v55_v6   ;;  %59 = vperm.xlu1 %638, %v53_v7   ;;  %v138_v30 = vld [vmem:[%s977_s5 + $0x38] sm:$0xff]  ;;  %v137_v34 = vld [vmem:[%s977_s5 + $0x30] sm:$0xff]  ;;  %v123_v47 = vld [vmem:[%s982_s4] sm:$0xff] }
   0xb   :  { %176 = vperm.xlu2 %639, %v138_v30   ;;  %v134_v42 = vld [vmem:[%s977_s5 + $0x18] sm:$0xff]  ;;  %v131_v48 = vld [vmem:[%s977_s5] sm:$0xff]  ;;  %v124_v49 = vld [vmem:[%s982_s4 + $0x8] sm:$0xff] }
   0xc   :  { %v333_v50 = vld [vmem:[%s979_s9 + $0x38] sm:$0xff]  ;;  %v125_v51 = vld [vmem:[%s982_s4 + $0x10] sm:$0xff]  ;;  %v330_v52 = vld [vmem:[%s979_s9 + $0x20] sm:$0xff] }
   0xd   :  { %v126_v53 = vld [vmem:[%s982_s4 + $0x18] sm:$0xff]  ;;  %v327_v54 = vld [vmem:[%s979_s9 + $0x8] sm:$0xff]  ;;  %v127_v55 = vld [vmem:[%s982_s4 + $0x20] sm:$0xff] }
   0xe   :  { %606 = vmatmul.msk.f32.gmra.mxu0 %vm77_vm0, %v50_v8  ;;  %v454_v56 = vld [vmem:[%s980_s11 + $0x10] sm:$0xff]  ;;  %v128_v57 = vld [vmem:[%s982_s4 + $0x28] sm:$0xff]  ;;  %v525_v60 = vld [vmem:[%s981_s13] sm:$0xff] }
   0xf   :  { %v527_v58 = vld [vmem:[%s981_s13 + $0x10] sm:$0xff]  ;;  %v130_v61 = vld [vmem:[%s982_s4 + $0x38] sm:$0xff]  ;;  %v253_v30 = vld [vmem:[%s983_s6] sm:$0xff] }
  0x10   :  { %v129_v59 = vld [vmem:[%s982_s4 + $0x30] sm:$0xff] }
  0x12   :  { %166 = vperm.xlu0 %637, %v136_v9   ;;  %161 = vperm.xlu1 %638, %v135_v10  }
  0x13   :  { %171 = vperm.xlu2 %639, %v137_v34  }
  0x16   :  { %607 = vmatmul.msk.f32.gmra.mxu0 %vm77_vm0, %v51_v11 }
  0x1a   :  { %151 = vperm.xlu0 %637, %v133_v12   ;;  %146 = vperm.xlu1 %638, %v132_v13  }
  0x1b   :  { %156 = vperm.xlu2 %639, %v134_v42  }
  0x1e   :  { %608 = vmatmul.msk.f32.gmra.mxu0 %vm77_vm0, %v52_v14 }
  0x22   :  { %266 = vperm.xlu0 %637, %v257_v15   ;;  %261 = vperm.xlu1 %638, %v256_v16  }
  0x23   :  { %141 = vperm.xlu2 %639, %v131_v48  }
  0x2a   :  { %366 = vperm.xlu0 %637, %v332_v17   ;;  %361 = vperm.xlu1 %638, %v331_v18  }
  0x2b   :  { %371 = vperm.xlu2 %639, %v333_v50   ;;  %v312_v50 = vld [vmem:[%s985_s1] sm:$0xff] }
  0x32   :  { %351 = vperm.xlu0 %637, %v329_v19   ;;  %346 = vperm.xlu1 %638, %v328_v20  }
  0x33   :  { %356 = vperm.xlu2 %639, %v330_v52  }
  0x3a   :  { %336 = vperm.xlu0 %637, %v326_v21   ;;  %473 = vperm.xlu1 %638, %v455_v22  }
  0x3b   :  { %341 = vperm.xlu2 %639, %v327_v54   ;;  %v318_v54 = vld [vmem:[%s986_s8] sm:$0xff] }
  0x42   :  { %463 = vperm.xlu0 %637, %v453_v23   ;;  %458 = vperm.xlu1 %638, %v452_v24  }
  0x43   :  { %468 = vperm.xlu2 %639, %v454_v56   ;;  %v320_v56 = vld [vmem:[%s986_s8 + $0x10] sm:$0xff] }
  0x4a   :  { %546 = vperm.xlu0 %637, %v528_v25   ;;  %271 = vperm.xlu1 %638, %v258_v26  }
  0x4b   :  { %541 = vperm.xlu2 %639, %v527_v58   ;;  %v322_v58 = vld [vmem:[%s986_s8 + $0x20] sm:$0xff] }
  0x52   :  { %536 = vperm.xlu0 %637, %v526_v27  }
  0x53   :  { %531 = vperm.xlu2 %639, %v525_v60   ;;  %v324_v60 = vld [vmem:[%s986_s8 + $0x30] sm:$0xff] }
  0x65   :  { %v177_v3 = vpop.permute.xlu2 %176 }
  0x6d   :  { %v172_v5 = vpop.permute.xlu2 %171 }
  0x74   :  { %v75_v31 = vpop.permute.xlu0 %74  ;;  %v65_v33 = vpop.permute.xlu1 %64 }
  0x75   :  { %v157_v12 = vpop.permute.xlu2 %156 }
  0x7c   :  { %v70_v35 = vpop.permute.xlu0 %69  ;;  %v60_v41 = vpop.permute.xlu1 %59 }
  0x7d   :  { %v142_v25 = vpop.permute.xlu2 %141 }
  0x83   :  { %v107_v28 = vpop.f32.mrf.mxu0 }
  0x84   :  { %v108_v43 = vadd.f32 %v107_v28, %v60_v41  ;;  %v167_v7 = vpop.permute.xlu0 %166  ;;  %v162_v8 = vpop.permute.xlu1 %161 }
  0x86   :  { %v119_v46 = vmax.f32 %v108_v43, 0.0 }
  0x8b   :  { %v110_v29 = vpop.f32.mrf.mxu0 }
  0x8c   :  { %v111_v39 = vadd.f32 %v110_v29, %v65_v33  ;;  %v152_v19 = vpop.permute.xlu0 %151  ;;  %v147_v22 = vpop.permute.xlu1 %146 }
  0x8e   :  { %v120_v45 = vmax.f32 %v111_v39, 0.0 }
  0x93   :  { %v113_v32 = vpop.f32.mrf.mxu0 }
  0x94   :  { %v114_v37 = vadd.f32 %v113_v32, %v70_v35  ;;  %v255_v32 = vld [vmem:[%s983_s6 + $0x10] sm:$0xff]  ;;  %v262_v33 = vpop.permute.xlu1 %261 }
  0x96   :  { %v121_v44 = vmax.f32 %v114_v37, 0.0 }
  0x9b   :  { %v116_v36 = vpop.f32.mrf.mxu0 }
  0x9c   :  { %v117_v38 = vadd.f32 %v116_v36, %v75_v31  ;;  %v254_v31 = vld [vmem:[%s983_s6 + $0x8] sm:$0xff]  ;;  %v362_v34 = vpop.permute.xlu1 %361 }
  0x9e   :  { %v122_v40 = vmax.f32 %v117_v38, 0.0 }
  0xa0   :  { %216 = vmatpush.msra.mxu1 %v122_v40  ;;  %v267_v40 = vpop.permute.xlu0 %266 }
  0xa2   :  { %217 = vmatpush.msra.mxu1 %v121_v44 }
  0xa4   :  { %218 = vmatpush.msra.mxu1 %v120_v45  ;;  %v877_v35 = vpop.permute.xlu1 %346 }
  0xa6   :  { %219 = vmatpush.msra.mxu1 %v119_v46 }
  0xa7   :  { %609 = vmatmul.msk.f32.vlgmr.msra.gmra.mxu1 %vm179_vm1, %v123_v47 }
  0xac   :  { %v879_v36 = vpop.permute.xlu1 %473 }
  0xaf   :  { %610 = vmatmul.msk.f32.gmra.mxu1 %vm179_vm1, %v124_v49 }
  0xb4   :  { %v884_v39 = vpop.permute.xlu1 %458 }
  0xb7   :  { %611 = vmatmul.msk.f32.gmra.mxu1 %vm179_vm1, %v125_v51 }
  0xbc   :  { %v272_v46 = vpop.permute.xlu1 %271 }
  0xbf   :  { %612 = vmatmul.msk.f32.gmra.mxu1 %vm179_vm1, %v126_v53 }
  0xc7   :  { %613 = vmatmul.msk.f32.gmra.mxu1 %vm179_vm1, %v127_v55  ;;  %v319_v55 = vld [vmem:[%s986_s8 + $0x8] sm:$0xff] }
  0xcf   :  { %614 = vmatmul.msk.f32.gmra.mxu1 %vm179_vm1, %v128_v57  ;;  %v321_v57 = vld [vmem:[%s986_s8 + $0x18] sm:$0xff] }
  0xd7   :  { %615 = vmatmul.msk.f32.gmra.mxu1 %vm179_vm1, %v129_v59  ;;  %v323_v59 = vld [vmem:[%s986_s8 + $0x28] sm:$0xff] }
  0xdf   :  { %616 = vmatmul.msk.f32.gmra.mxu1 %vm179_vm1, %v130_v61  ;;  %v325_v61 = vld [vmem:[%s986_s8 + $0x38] sm:$0xff] }
 0x124   :  { %v221_v62 = vpop.f32.mrf.mxu1 }
 0x125   :  { %v222_v26 = vadd.f32 %v221_v62, %v142_v25 }
 0x127   :  { %v245_v29 = vmax.f32 %v222_v26, 0.0 }
 0x12c   :  { %v224_v63 = vpop.f32.mrf.mxu1 }
 0x12d   :  { %v225_v23 = vadd.f32 %v224_v63, %v147_v22 }
 0x12f   :  { %v246_v28 = vmax.f32 %v225_v23, 0.0 }
 0x134   :  { %v227_v0 = vpop.f32.mrf.mxu1 }
 0x135   :  { %v228_v20 = vadd.f32 %v227_v0, %v152_v19 }
 0x137   :  { %v247_v27 = vmax.f32 %v228_v20, 0.0 }
 0x13c   :  { %v230_v1 = vpop.f32.mrf.mxu1 }
 0x13d   :  { %v231_v17 = vadd.f32 %v230_v1, %v157_v12 }
 0x13f   :  { %v248_v24 = vmax.f32 %v231_v17, 0.0 }
 0x144   :  { %v233_v2 = vpop.f32.mrf.mxu1 }
 0x145   :  { %v234_v15 = vadd.f32 %v233_v2, %v162_v8 }
 0x147   :  { %v249_v21 = vmax.f32 %v234_v15, 0.0 }
 0x14c   :  { %v236_v4 = vpop.f32.mrf.mxu1 }
 0x14d   :  { %v237_v13 = vadd.f32 %v236_v4, %v167_v7  ;;  %v372_v4 = vpop.permute.xlu2 %371 }
 0x14f   :  { %v250_v18 = vmax.f32 %v237_v13, 0.0 }
 0x154   :  { %v239_v6 = vpop.f32.mrf.mxu1 }
 0x155   :  { %v240_v10 = vadd.f32 %v239_v6, %v172_v5  ;;  %v367_v5 = vpop.permute.xlu0 %366  ;;  %v357_v7 = vpop.permute.xlu2 %356 }
 0x157   :  { %v251_v16 = vmax.f32 %v240_v10, 0.0 }
 0x15c   :  { %v242_v9 = vpop.f32.mrf.mxu1 }
 0x15d   :  { %v243_v11 = vadd.f32 %v242_v9, %v177_v3  ;;  %v342_v20 = vpop.permute.xlu2 %341 }
 0x15f   :  { %v252_v14 = vmax.f32 %v243_v11, 0.0  ;;  %v352_v11 = vpop.permute.xlu0 %351 }
 0x161   :  { %292 = vmatpush.msra.mxu2 %v252_v14 }
 0x163   :  { %293 = vmatpush.msra.mxu2 %v251_v16 }
 0x165   :  { %294 = vmatpush.msra.mxu2 %v250_v18 }
 0x167   :  { %295 = vmatpush.msra.mxu2 %v249_v21  ;;  %v337_v23 = vpop.permute.xlu0 %336 }
 0x169   :  { %296 = vmatpush.msra.mxu2 %v248_v24 }
 0x16b   :  { %297 = vmatpush.msra.mxu2 %v247_v27 }
 0x16d   :  { %298 = vmatpush.msra.mxu2 %v246_v28  ;;  %v448_v28 = vld [vmem:[%s987_s10] sm:$0xff] }
 0x16f   :  { %299 = vmatpush.msra.mxu2 %v245_v29  ;;  %v449_v29 = vld [vmem:[%s987_s10 + $0x8] sm:$0xff] }
 0x170   :  { %617 = vmatmul.msk.f32.vlgmr.msra.gmra.mxu2 %vm274_vm2, %v253_v30  ;;  %v450_v30 = vld [vmem:[%s987_s10 + $0x10] sm:$0xff] }
 0x178   :  { %618 = vmatmul.msk.f32.gmra.mxu2 %vm274_vm2, %v254_v31  ;;  %v451_v31 = vld [vmem:[%s987_s10 + $0x18] sm:$0xff] }
 0x180   :  { %619 = vmatmul.msk.f32.gmra.mxu2 %vm274_vm2, %v255_v32 }
 0x1f3   :  { %v301_v37 = vpop.f32.mrf.mxu2 }
 0x1f4   :  { %v302_v38 = vadd.f32 %v301_v37, %v262_v33 }
 0x1f6   :  { %596 = vst [vmem:[%s984_s14 + $0x10] sm:$0xff] %v302_v38 }
 0x1fb   :  { %v304_v41 = vpop.f32.mrf.mxu2 }
 0x1fc   :  { %v305_v42 = vadd.f32 %v304_v41, %v267_v40  ;;  %v464_v41 = vpop.permute.xlu0 %463 }
 0x1fe   :  { %v310_v43 = vmax.f32 %v305_v42, -10.0 }
 0x200   :  { %v311_v44 = vmin.f32 %v310_v43, 5.0 }
 0x202   :  { %v313_v45 = vmul.f32 0.5, %v311_v44  ;;  %597 = vst [vmem:[%s984_s14 + $0x18] sm:$0xff] %v311_v44 }
 0x203   :  { %v307_v47 = vpop.f32.mrf.mxu2 }
 0x204   :  { %v314_v48 = vmul.f32 1.442695, %v313_v45  ;;  %v308_v49 = vadd.f32 %v307_v47, %v272_v46 }
 0x206   :  { %640 = vpow2.f32 %v314_v48  ;;  %600 = vst [vmem:[%s984_s14 + $0x30] sm:$0xff] %v308_v49  ;;  %v521_v48 = vld [vmem:[%s988_s12] sm:$0xff]  ;;  %v524_v49 = vld [vmem:[%s988_s12 + $0x18] sm:$0xff] }
 0x20c   :  { %v641_v51 = vpop.eup %640 }
 0x20d   :  { %v316_v52 = vmul.f32 %v641_v51, %v312_v50  ;;  %v547_v51 = vpop.permute.xlu0 %546 }
 0x20f   :  { %v317_v53 = vadd.f32 %v316_v52, %v302_v38 }
 0x211   :  { %414 = vmatpush.msra.mxu3 %v317_v53 }
 0x212   :  { %620 = vmatmul.msk.f32.vlgmr.msra.gmra.mxu3 %vm374_vm3, %v318_v54 }
 0x21a   :  { %621 = vmatmul.msk.f32.gmra.mxu3 %vm374_vm3, %v319_v55  ;;  %v537_v55 = vpop.permute.xlu0 %536 }
 0x222   :  { %622 = vmatmul.msk.f32.gmra.mxu3 %vm374_vm3, %v320_v56 }
 0x22a   :  { %623 = vmatmul.msk.f32.gmra.mxu3 %vm374_vm3, %v321_v57 }
 0x232   :  { %624 = vmatmul.msk.f32.gmra.mxu3 %vm374_vm3, %v322_v58 }
 0x23a   :  { %625 = vmatmul.msk.f32.gmra.mxu3 %vm374_vm3, %v323_v59 }
 0x242   :  { %626 = vmatmul.msk.f32.gmra.mxu3 %vm374_vm3, %v324_v60 }
 0x24a   :  { %627 = vmatmul.msk.f32.gmra.mxu3 %vm374_vm3, %v325_v61 }
 0x295   :  { %v416_v62 = vpop.f32.mrf.mxu3 }
 0x296   :  { %v417_v24 = vadd.f32 %v416_v62, %v337_v23 }
 0x298   :  { %v440_v27 = vmax.f32 %v417_v24, 0.0 }
 0x29d   :  { %v419_v63 = vpop.f32.mrf.mxu3 }
 0x29e   :  { %v420_v21 = vadd.f32 %v419_v63, %v342_v20 }
 0x2a0   :  { %v441_v26 = vmax.f32 %v420_v21, 0.0 }
 0x2a5   :  { %v422_v0 = vpop.f32.mrf.mxu3 }
 0x2a6   :  { %v423_v18 = vadd.f32 %v422_v0, %v877_v35  ;;  %v469_v35 = vpop.permute.xlu2 %468 }
 0x2a8   :  { %v442_v25 = vmax.f32 %v423_v18, 0.0 }
 0x2ad   :  { %v425_v1 = vpop.f32.mrf.mxu3 }
 0x2ae   :  { %v426_v16 = vadd.f32 %v425_v1, %v352_v11  ;;  %v542_v50 = vpop.permute.xlu2 %541 }
 0x2b0   :  { %v443_v22 = vmax.f32 %v426_v16, 0.0 }
 0x2b5   :  { %v428_v2 = vpop.f32.mrf.mxu3 }
 0x2b6   :  { %v429_v14 = vadd.f32 %v428_v2, %v357_v7  ;;  %v532_v52 = vpop.permute.xlu2 %531 }
 0x2b8   :  { %v444_v19 = vmax.f32 %v429_v14, 0.0 }
 0x2bd   :  { %v431_v3 = vpop.f32.mrf.mxu3 }
 0x2be   :  { %v432_v12 = vadd.f32 %v431_v3, %v362_v34 }
 0x2c0   :  { %v445_v17 = vmax.f32 %v432_v12, 0.0 }
 0x2c5   :  { %v434_v6 = vpop.f32.mrf.mxu3 }
 0x2c6   :  { %v435_v9 = vadd.f32 %v434_v6, %v367_v5 }
 0x2c8   :  { %v446_v15 = vmax.f32 %v435_v9, 0.0 }
 0x2cd   :  { %v437_v8 = vpop.f32.mrf.mxu3 }
 0x2ce   :  { %v438_v10 = vadd.f32 %v437_v8, %v372_v4 }
 0x2d0   :  { %v447_v13 = vmax.f32 %v438_v10, 0.0 }
 0x2d2   :  { %496 = vmatpush.msrb.mxu0 %v447_v13 }
 0x2d4   :  { %497 = vmatpush.msrb.mxu0 %v446_v15 }
 0x2d6   :  { %498 = vmatpush.msrb.mxu0 %v445_v17 }
 0x2d8   :  { %499 = vmatpush.msrb.mxu0 %v444_v19 }
 0x2da   :  { %500 = vmatpush.msrb.mxu0 %v443_v22 }
 0x2dc   :  { %501 = vmatpush.msrb.mxu0 %v442_v25 }
 0x2de   :  { %502 = vmatpush.msrb.mxu0 %v441_v26 }
 0x2e0   :  { %503 = vmatpush.msrb.mxu0 %v440_v27 }
 0x2e1   :  { %628 = vmatmul.msk.f32.vlgmr.msrb.gmra.mxu0 %vm274_vm2, %v448_v28 }
 0x2e9   :  { %629 = vmatmul.msk.f32.gmra.mxu0 %vm274_vm2, %v449_v29 }
 0x2f1   :  { %630 = vmatmul.msk.f32.gmra.mxu0 %vm274_vm2, %v450_v30 }
 0x2f9   :  { %631 = vmatmul.msk.f32.gmra.mxu0 %vm274_vm2, %v451_v31 }
 0x35e   :  { %v505_v32 = vpop.f32.mrf.mxu0 }
 0x35f   :  { %v506_v44 = vadd.f32 %v505_v32, %v884_v39  ;;  %v523_v39 = vld [vmem:[%s988_s12 + $0x10] sm:$0xff] }
 0x361   :  { %v517_v47 = vmax.f32 %v506_v44, 0.0 }
 0x366   :  { %v508_v33 = vpop.f32.mrf.mxu0 }
 0x367   :  { %v509_v42 = vadd.f32 %v508_v33, %v464_v41 }
 0x369   :  { %v518_v46 = vmax.f32 %v509_v42, 0.0 }
 0x36e   :  { %v511_v34 = vpop.f32.mrf.mxu0 }
 0x36f   :  { %v512_v38 = vadd.f32 %v511_v34, %v469_v35 }
 0x371   :  { %v519_v45 = vmax.f32 %v512_v38, 0.0 }
 0x376   :  { %v514_v37 = vpop.f32.mrf.mxu0 }
 0x377   :  { %v515_v40 = vadd.f32 %v514_v37, %v879_v36  ;;  %v522_v36 = vld [vmem:[%s988_s12 + $0x8] sm:$0xff] }
 0x379   :  { %v520_v43 = vmax.f32 %v515_v40, 0.0 }
 0x37b   :  { %573 = vmatpush.msrb.mxu2 %v520_v43 }
 0x37d   :  { %574 = vmatpush.msrb.mxu2 %v519_v45 }
 0x37f   :  { %575 = vmatpush.msrb.mxu2 %v518_v46 }
 0x381   :  { %576 = vmatpush.msrb.mxu2 %v517_v47 }
 0x382   :  { %632 = vmatmul.msk.f32.vlgmr.msrb.gmra.mxu2 %vm179_vm1, %v521_v48 }
 0x38a   :  { %633 = vmatmul.msk.f32.gmra.mxu2 %vm179_vm1, %v522_v36 }
 0x392   :  { %634 = vmatmul.msk.f32.gmra.mxu2 %vm179_vm1, %v523_v39 }
 0x39a   :  { %635 = vmatmul.msk.f32.gmra.mxu2 %vm179_vm1, %v524_v49 }
 0x405   :  { %v578_v53 = vpop.f32.mrf.mxu2 }
 0x406   :  { %v579_v54 = vadd.f32 %v578_v53, %v532_v52 }
 0x408   :  { %594 = vst [vmem:[%s984_s14] sm:$0xff] %v579_v54 }
 0x40d   :  { %v581_v56 = vpop.f32.mrf.mxu2 }
 0x40e   :  { %v582_v57 = vadd.f32 %v581_v56, %v537_v55 }
 0x410   :  { %595 = vst [vmem:[%s984_s14 + $0x8] sm:$0xff] %v582_v57 }
 0x415   :  { %v584_v58 = vpop.f32.mrf.mxu2 }
 0x416   :  { %v585_v59 = vadd.f32 %v584_v58, %v542_v50 }
 0x418   :  { %v590_v60 = vmax.f32 %v585_v59, -3.0 }
 0x41a   :  { %v592_v61 = vmin.f32 %v590_v60, 0.0 }
 0x41c   :  { %598 = vst [vmem:[%s984_s14 + $0x20] sm:$0xff] %v592_v61 }
 0x41d   :  { %v587_v62 = vpop.f32.mrf.mxu2 }
 0x41e   :  { %v588_v63 = vadd.f32 %v587_v62, %v547_v51 }
 0x420   :  { %v591_v0 = vmax.f32 %v588_v63, -3.0 }
 0x422   :  { %v593_v1 = vmin.f32 %v591_v0, 0.0 }
 0x424   :  { %599 = vst [vmem:[%s984_s14 + $0x28] sm:$0xff] %v593_v1 }

</bundles_post_ra>
